<compile_context>
chip_gen: v7x
topology: tpu7x:2x2x1
jax: 0.10.0
libtpu: 0.0.40
codegen_flags: <defaults>
</compile_context>

<pallas_src>
import functools

import jax
import jax.numpy as jnp
from jax.experimental import pallas as pl
from jax.experimental.pallas import tpu as pltpu

EPS = 1e-5

_VMEM = pl.BlockSpec(memory_space=pltpu.MemorySpace.VMEM)


# ----------------------------- Pallas kernel ------------------------------

def fused_residual_block_kernel(xp_ref, b1_ref, b2_ref, proj_ref, bn_ref,
                                out_ref, h1p_ref, *, h, inv_cnt):
    """Fused conv3x3 -> BN -> ReLU -> conv3x3 -> BN -> +residual -> ReLU.

    Layouts (last dim = lanes, L = N*W*C):
      xp_ref  : (H+2, L) f32   H-padded input; rows 1..H are also the residual
      b*_ref  : (3, L, L) bf16 block-diag banded conv weights, one slab per dy
      proj_ref: (L, L)   f32   same-channel indicator (per-channel reduce/tile)
      bn_ref  : (4, L)   f32   [gamma1, beta1, gamma2, beta2] in lane layout
      out_ref : (H, L)   f32
      h1p_ref : (H+2, L) bf16  VMEM scratch: H-padded hidden activation h1
    """

    def conv3x3(src_ref, b_ref):
        # One (H, L) x (L, L) MXU matmul per dy tap; the banded weight folds
        # the dx taps, the channel contraction, the batch block-diagonal and
        # the W-edge truncation (zero columns at the image borders).
        acc = jnp.dot(src_ref[0:h, :].astype(jnp.bfloat16), b_ref[0],
                      preferred_element_type=jnp.float32)
        for dy in (1, 2):
            acc = acc + jnp.dot(src_ref[dy:dy + h, :].astype(jnp.bfloat16),
                                b_ref[dy],
                                preferred_element_type=jnp.float32)
        return acc                                        # (H, L) f32

    def bn_scale_shift(acc, gamma_row, beta_row):
        # Training-mode batch statistics over (N, H, W) per channel, returned
        # as per-lane scale/shift so normalization is a single FMA.  The two
        # per-lane moment rows are reduced to per-channel values (and re-tiled
        # across lanes) with ONE (2, L) @ (L, L) projector matmul.
        s1 = jnp.sum(acc, axis=0, keepdims=True)          # (1, L) sum
        s2 = jnp.sum(acc * acc, axis=0, keepdims=True)    # (1, L) sum of sq
        stats = jnp.concatenate([s1, s2], axis=0) * inv_cnt
        red = jnp.dot(stats, proj_ref[...],
                      preferred_element_type=jnp.float32)  # (2, L)
        mean = red[0:1, :]
        var = jnp.maximum(red[1:2, :] - mean * mean, 0.0)  # clamp E[x^2]-E[x]^2
        scale = gamma_row * jax.lax.rsqrt(var + EPS)
        shift = beta_row - mean * scale
        return scale, shift

    # ---- stage 1: conv1 -> BN1 -> ReLU, kept resident in VMEM scratch ----
    acc1 = conv3x3(xp_ref, b1_ref)
    sc1, sh1 = bn_scale_shift(acc1, bn_ref[0:1, :], bn_ref[1:2, :])
    h1 = jnp.maximum(acc1 * sc1 + sh1, 0.0)
    zero_row = jnp.zeros((1, h1p_ref.shape[1]), h1p_ref.dtype)
    h1p_ref[0:1, :] = zero_row                            # top H-halo only
    h1p_ref[h + 1:h + 2, :] = zero_row                    # bottom H-halo only
    h1p_ref[1:1 + h, :] = h1.astype(h1p_ref.dtype)        # interior

    # ---- stage 2: conv2 -> BN2 -> +residual -> ReLU ----
    acc2 = conv3x3(h1p_ref, b2_ref)
    sc2, sh2 = bn_scale_shift(acc2, bn_ref[2:3, :], bn_ref[3:4, :])
    res = xp_ref[1:1 + h, :]                              # f32 residual
    out_ref[...] = jnp.maximum(acc2 * sc2 + sh2 + res, 0.0)


# ------------------------------ JAX wrapper --------------------------------

def _banded_weights(wt, n, w_dim, c):
    """HWIO (3,3,Cin,Cout) -> (3, N*W*C, N*W*C) block-diag banded matrices.

    Within one image block:
      B[dy][p*C + ci, q*C + co] = wt[dy, p - q + 1, ci, co]
    valid only for 0 <= p - q + 1 <= 2 and 0 <= p < W (so the W-edge padding
    taps become zero columns); blocks for different images are independent
    (block-diagonal).  A 3x3 conv over the H-padded (Hp, N*W*C) layout is
        out[hh, :] = sum_dy  xp[hh + dy, :] @ B[dy].
    """
    dx = jnp.arange(3)
    p_idx = jnp.arange(w_dim)
    q_idx = jnp.arange(w_dim)
    sel = (p_idx[None, :, None] ==
           (q_idx[None, None, :] + dx[:, None, None] - 1)).astype(jnp.float32)
    blk = jnp.einsum('xpq,yxio->ypiqo', sel, wt.astype(jnp.float32))
    blk = blk.reshape(3, w_dim * c, w_dim * c)
    full = jnp.einsum('ab,ypq->yapbq', jnp.eye(n, dtype=jnp.float32), blk)
    return full.reshape(3, n * w_dim * c, n * w_dim * c).astype(jnp.bfloat16)


def _tile_lane(v, n, w_dim, c):
    """Per-channel (C,) / (1,C) vector -> (N*W*C,) lane layout."""
    return jnp.tile(jnp.reshape(v, (1, c)), (1, n * w_dim)).reshape(n * w_dim * c)


@jax.jit
def residual_block_forward(x_nchw, params):
    """ResidualBlock.forward with stride=1, i_downsample=None."""
    w1, b1, g1, be1, w2, b2, g2, be2 = params
    # NOTE: conv biases b1/b2 are mathematically cancelled by training-mode
    # BN mean subtraction, so they are not sent to the kernel (dead compute).
    del b1, b2
    n, c, h, w = x_nchw.shape
    lanes = n * w * c                      # 128 for the toy shape: full vreg

    # (N,C,H,W) -> (H,N,W,C) -> H-pad -> (H+2, N*W*C) lane-dense layout.
    # This single f32 array is both the conv1 input and the residual.
    xt = jnp.transpose(x_nchw, (2, 0, 3, 1)).astype(jnp.float32)
    xp = jnp.pad(xt, ((1, 1), (0, 0), (0, 0), (0, 0))).reshape(h + 2, lanes)

    b1m = _banded_weights(w1, n, w, c)
    b2m = _banded_weights(w2, n, w, c)

    # Projector P[i, j] = (i % C == j % C): sums per-lane stats over (n, w)
    # per channel and re-tiles the per-channel result across all lanes.
    lane_ch = jnp.arange(lanes) % c
    proj = (lane_ch[:, None] == lane_ch[None, :]).astype(jnp.float32)

    bn_pack = jnp.stack(
        [_tile_lane(g1, n, w, c), _tile_lane(be1, n, w, c),
         _tile_lane(g2, n, w, c), _tile_lane(be2, n, w, c)],
        axis=0).astype(jnp.float32)                                  # (4, L)

    out = pl.pallas_call(
        functools.partial(fused_residual_block_kernel,
                          h=h, inv_cnt=1.0 / float(n * h * w)),
        out_shape=jax.ShapeDtypeStruct((h, lanes), jnp.float32),
        in_specs=[_VMEM] * 5,
        out_specs=_VMEM,
        scratch_shapes=[pltpu.VMEM((h + 2, lanes), jnp.bfloat16)],
    )(xp, b1m, b2m, proj, bn_pack)

    # (H, N*W*C) -> (H,N,W,C) -> NCHW
    return jnp.transpose(out.reshape(h, n, w, c), (1, 3, 0, 2))


# --------------------------- pure-JAX reference ----------------------------

def reference_forward(x_nchw, params):
    w1, b1, g1, be1, w2, b2, g2, be2 = params

    def conv(x, wt, b):
        y = jax.lax.conv_general_dilated(
            x, wt, window_strides=(1, 1), padding="SAME",
            dimension_numbers=("NHWC", "HWIO", "NHWC"))
        return y + b.reshape(1, 1, 1, -1)

    def bn(y, g, be):
        mean = jnp.mean(y, axis=(0, 1, 2), keepdims=True)
        var = jnp.mean((y - mean) ** 2, axis=(0, 1, 2), keepdims=True)
        return ((y - mean) * jax.lax.rsqrt(var + EPS)
                * g.reshape(1, 1, 1, -1) + be.reshape(1, 1, 1, -1))

    x = jnp.transpose(x_nchw, (0, 2, 3, 1)).astype(jnp.float32)
    h1 = jnp.maximum(bn(conv(x, w1, b1), g1, be1), 0.0)
    h2 = bn(conv(h1, w2, b2), g2, be2)
    return jnp.transpose(jnp.maximum(h2 + x, 0.0), (0, 3, 1, 2))


# --------------------------------- main ------------------------------------

if __name__ == "__main__":
    # in_channels = out_channels = 4, stride = 1, i_downsample = None
    N, C, H, W = 2, 4, 16, 16

    key = jax.random.PRNGKey(0)
    kx, kw1, kb1, kw2, kb2 = jax.random.split(key, 5)

    x = jax.random.normal(kx, (N, C, H, W), jnp.float32)

    # Deterministic parameter init (conv weights in HWIO; BN gamma=1, beta=0).
    w1 = 0.1 * jax.random.normal(kw1, (3, 3, C, C), jnp.float32)
    b1 = 0.1 * jax.random.normal(kb1, (1, C), jnp.float32)
    g1 = jnp.ones((1, C), jnp.float32)
    be1 = jnp.zeros((1, C), jnp.float32)

    w2 = 0.1 * jax.random.normal(kw2, (3, 3, C, C), jnp.float32)
    b2 = 0.1 * jax.random.normal(kb2, (1, C), jnp.float32)
    g2 = jnp.ones((1, C), jnp.float32)
    be2 = jnp.zeros((1, C), jnp.float32)

    params = (w1, b1, g1, be1, w2, b2, g2, be2)

    out = jax.block_until_ready(residual_block_forward(x, params))
    ref = jax.block_until_ready(reference_forward(x, params))

    assert out.shape == (N, C, H, W)
    # Tolerance is 3e-2 because the kernel feeds the MXU bf16 operands while
    # the reference stays pure f32; accumulation and all BN/elementwise math
    # in the kernel remain f32.
    maxdiff = float(jnp.max(jnp.abs(out - ref)))
    assert jnp.allclose(out, ref, rtol=3e-2, atol=3e-2), maxdiff

    print("KERNEL_OK")
</pallas_src>

<mosaic_0001>
module attributes {stable_mosaic.version = 11 : i64} {
  func.func @fused_residual_block_kernel(%arg0: memref<18x128xf32, #tpu.memory_space<vmem>>, %arg1: memref<3x128x128xbf16, #tpu.memory_space<vmem>>, %arg2: memref<3x128x128xbf16, #tpu.memory_space<vmem>>, %arg3: memref<128x128xf32, #tpu.memory_space<vmem>>, %arg4: memref<4x128xf32, #tpu.memory_space<vmem>>, %arg5: memref<16x128xf32, #tpu.memory_space<vmem>>, %arg6: memref<18x128xbf16, #tpu.memory_space<vmem>>) attributes {dimension_semantics = [], scalar_prefetch = 0 : i64, scratch_operands = 1 : i64, tpu.core_type = #tpu.core_type<tc>} {
    %c0 = arith.constant 0 : index
    %c0_0 = arith.constant 0 : index
    %0 = vector.load %arg0[%c0, %c0_0] : memref<18x128xf32, #tpu.memory_space<vmem>>, vector<16x128xf32>
    %1 = arith.truncf %0 : vector<16x128xf32> to vector<16x128xbf16>
    %c0_1 = arith.constant 0 : index
    %c0_2 = arith.constant 0 : index
    %c0_3 = arith.constant 0 : index
    %2 = vector.load %arg1[%c0_1, %c0_2, %c0_3] : memref<3x128x128xbf16, #tpu.memory_space<vmem>>, vector<1x128x128xbf16>
    %3 = vector.shape_cast %2 : vector<1x128x128xbf16> to vector<128x128xbf16>
    %cst = arith.constant dense<0.000000e+00> : vector<16x128xf32>
    %4 = tpu.matmul %1, %3, %cst {dimension_numbers = #tpu.dot_dimension_numbers<[1], [0], [0], [1], [0, 0, 1, 1], [], []>} : vector<16x128xbf16>, vector<128x128xbf16>, vector<16x128xf32> -> vector<16x128xf32>
    %c1 = arith.constant 1 : index
    %c0_4 = arith.constant 0 : index
    %5 = vector.load %arg0[%c1, %c0_4] : memref<18x128xf32, #tpu.memory_space<vmem>>, vector<16x128xf32>
    %6 = arith.truncf %5 : vector<16x128xf32> to vector<16x128xbf16>
    %c1_5 = arith.constant 1 : index
    %c0_6 = arith.constant 0 : index
    %c0_7 = arith.constant 0 : index
    %7 = vector.load %arg1[%c1_5, %c0_6, %c0_7] : memref<3x128x128xbf16, #tpu.memory_space<vmem>>, vector<1x128x128xbf16>
    %8 = vector.shape_cast %7 : vector<1x128x128xbf16> to vector<128x128xbf16>
    %cst_8 = arith.constant dense<0.000000e+00> : vector<16x128xf32>
    %9 = tpu.matmul %6, %8, %cst_8 {dimension_numbers = #tpu.dot_dimension_numbers<[1], [0], [0], [1], [0, 0, 1, 1], [], []>} : vector<16x128xbf16>, vector<128x128xbf16>, vector<16x128xf32> -> vector<16x128xf32>
    %10 = arith.addf %4, %9 : vector<16x128xf32>
    %c2 = arith.constant 2 : index
    %c0_9 = arith.constant 0 : index
    %11 = vector.load %arg0[%c2, %c0_9] : memref<18x128xf32, #tpu.memory_space<vmem>>, vector<16x128xf32>
    %12 = arith.truncf %11 : vector<16x128xf32> to vector<16x128xbf16>
    %c2_10 = arith.constant 2 : index
    %c0_11 = arith.constant 0 : index
    %c0_12 = arith.constant 0 : index
    %13 = vector.load %arg1[%c2_10, %c0_11, %c0_12] : memref<3x128x128xbf16, #tpu.memory_space<vmem>>, vector<1x128x128xbf16>
    %14 = vector.shape_cast %13 : vector<1x128x128xbf16> to vector<128x128xbf16>
    %cst_13 = arith.constant dense<0.000000e+00> : vector<16x128xf32>
    %15 = tpu.matmul %12, %14, %cst_13 {dimension_numbers = #tpu.dot_dimension_numbers<[1], [0], [0], [1], [0, 0, 1, 1], [], []>} : vector<16x128xbf16>, vector<128x128xbf16>, vector<16x128xf32> -> vector<16x128xf32>
    %16 = arith.addf %10, %15 : vector<16x128xf32>
    %c0_14 = arith.constant 0 : index
    %c0_15 = arith.constant 0 : index
    %17 = vector.load %arg4[%c0_14, %c0_15] : memref<4x128xf32, #tpu.memory_space<vmem>>, vector<1x128xf32>
    %c1_16 = arith.constant 1 : index
    %c0_17 = arith.constant 0 : index
    %18 = vector.load %arg4[%c1_16, %c0_17] : memref<4x128xf32, #tpu.memory_space<vmem>>, vector<1x128xf32>
    %cst_18 = arith.constant dense<0.000000e+00> : vector<128xf32>
    %19 = vector.multi_reduction <add>, %16, %cst_18 [0] : vector<16x128xf32> to vector<128xf32>
    %20 = vector.shape_cast %19 : vector<128xf32> to vector<1x128xf32>
    %21 = arith.mulf %16, %16 : vector<16x128xf32>
    %cst_19 = arith.constant dense<0.000000e+00> : vector<128xf32>
    %22 = vector.multi_reduction <add>, %21, %cst_19 [0] : vector<16x128xf32> to vector<128xf32>
    %23 = vector.shape_cast %22 : vector<128xf32> to vector<1x128xf32>
    %24 = tpu.concatenate %20, %23 in 0 : vector<1x128xf32>, vector<1x128xf32> -> vector<2x128xf32>
    %cst_20 = arith.constant 0.001953125 : f32
    %25 = vector.broadcast %cst_20 : f32 to vector<2x128xf32>
    %26 = arith.mulf %24, %25 : vector<2x128xf32>
    %c0_21 = arith.constant 0 : index
    %c0_22 = arith.constant 0 : index
    %27 = vector.load %arg3[%c0_21, %c0_22] : memref<128x128xf32, #tpu.memory_space<vmem>>, vector<128x128xf32>
    %cst_23 = arith.constant dense<0.000000e+00> : vector<2x128xf32>
    %28 = tpu.matmul %26, %27, %cst_23 {dimension_numbers = #tpu.dot_dimension_numbers<[1], [0], [0], [1], [0, 0, 1, 1], [], []>} : vector<2x128xf32>, vector<128x128xf32>, vector<2x128xf32> -> vector<2x128xf32>
    %29 = vector.extract_strided_slice %28 {offsets = [0, 0], sizes = [1, 128], strides = [1, 1]} : vector<2x128xf32> to vector<1x128xf32>
    %30 = vector.extract_strided_slice %28 {offsets = [1, 0], sizes = [1, 128], strides = [1, 1]} : vector<2x128xf32> to vector<1x128xf32>
    %31 = arith.mulf %29, %29 : vector<1x128xf32>
    %32 = arith.subf %30, %31 : vector<1x128xf32>
    %cst_24 = arith.constant 0.000000e+00 : f32
    %33 = vector.broadcast %cst_24 : f32 to vector<1x128xf32>
    %34 = arith.maximumf %32, %33 : vector<1x128xf32>
    %cst_25 = arith.constant 9.99999974E-6 : f32
    %35 = vector.broadcast %cst_25 : f32 to vector<1x128xf32>
    %36 = arith.addf %34, %35 : vector<1x128xf32>
    %37 = math.rsqrt %36 : vector<1x128xf32>
    %38 = arith.mulf %17, %37 : vector<1x128xf32>
    %39 = arith.mulf %29, %38 : vector<1x128xf32>
    %40 = arith.subf %18, %39 : vector<1x128xf32>
    %41 = vector.broadcast %38 : vector<1x128xf32> to vector<16x128xf32>
    %42 = arith.mulf %16, %41 : vector<16x128xf32>
    %43 = vector.broadcast %40 : vector<1x128xf32> to vector<16x128xf32>
    %44 = arith.addf %42, %43 : vector<16x128xf32>
    %cst_26 = arith.constant 0.000000e+00 : f32
    %45 = vector.broadcast %cst_26 : f32 to vector<16x128xf32>
    %46 = arith.maximumf %44, %45 : vector<16x128xf32>
    %cst_27 = arith.constant 0.000000e+00 : bf16
    %47 = vector.broadcast %cst_27 : bf16 to vector<1x128xbf16>
    %c0_28 = arith.constant 0 : index
    %c0_29 = arith.constant 0 : index
    %48 = vector.load %arg6[%c0_28, %c0_29] : memref<18x128xbf16, #tpu.memory_space<vmem>>, vector<1x128xbf16>
    tpu.vector_store %arg6[%c0_28, %c0_29], %47 {strides = array<i32>} : memref<18x128xbf16, #tpu.memory_space<vmem>>, vector<1x128xbf16>,
    %c17 = arith.constant 17 : index
    %c0_30 = arith.constant 0 : index
    %49 = vector.load %arg6[%c17, %c0_30] : memref<18x128xbf16, #tpu.memory_space<vmem>>, vector<1x128xbf16>
    tpu.vector_store %arg6[%c17, %c0_30], %47 {strides = array<i32>} : memref<18x128xbf16, #tpu.memory_space<vmem>>, vector<1x128xbf16>,
    %50 = arith.truncf %46 : vector<16x128xf32> to vector<16x128xbf16>
    %c1_31 = arith.constant 1 : index
    %c0_32 = arith.constant 0 : index
    %51 = vector.load %arg6[%c1_31, %c0_32] : memref<18x128xbf16, #tpu.memory_space<vmem>>, vector<16x128xbf16>
    tpu.vector_store %arg6[%c1_31, %c0_32], %50 {strides = array<i32>} : memref<18x128xbf16, #tpu.memory_space<vmem>>, vector<16x128xbf16>,
    %c0_33 = arith.constant 0 : index
    %c0_34 = arith.constant 0 : index
    %52 = vector.load %arg6[%c0_33, %c0_34] : memref<18x128xbf16, #tpu.memory_space<vmem>>, vector<16x128xbf16>
    %c0_35 = arith.constant 0 : index
    %c0_36 = arith.constant 0 : index
    %c0_37 = arith.constant 0 : index
    %53 = vector.load %arg2[%c0_35, %c0_36, %c0_37] : memref<3x128x128xbf16, #tpu.memory_space<vmem>>, vector<1x128x128xbf16>
    %54 = vector.shape_cast %53 : vector<1x128x128xbf16> to vector<128x128xbf16>
    %cst_38 = arith.constant dense<0.000000e+00> : vector<16x128xf32>
    %55 = tpu.matmul %52, %54, %cst_38 {dimension_numbers = #tpu.dot_dimension_numbers<[1], [0], [0], [1], [0, 0, 1, 1], [], []>} : vector<16x128xbf16>, vector<128x128xbf16>, vector<16x128xf32> -> vector<16x128xf32>
    %c1_39 = arith.constant 1 : index
    %c0_40 = arith.constant 0 : index
    %56 = vector.load %arg6[%c1_39, %c0_40] : memref<18x128xbf16, #tpu.memory_space<vmem>>, vector<16x128xbf16>
    %c1_41 = arith.constant 1 : index
    %c0_42 = arith.constant 0 : index
    %c0_43 = arith.constant 0 : index
    %57 = vector.load %arg2[%c1_41, %c0_42, %c0_43] : memref<3x128x128xbf16, #tpu.memory_space<vmem>>, vector<1x128x128xbf16>
    %58 = vector.shape_cast %57 : vector<1x128x128xbf16> to vector<128x128xbf16>
    %cst_44 = arith.constant dense<0.000000e+00> : vector<16x128xf32>
    %59 = tpu.matmul %56, %58, %cst_44 {dimension_numbers = #tpu.dot_dimension_numbers<[1], [0], [0], [1], [0, 0, 1, 1], [], []>} : vector<16x128xbf16>, vector<128x128xbf16>, vector<16x128xf32> -> vector<16x128xf32>
    %60 = arith.addf %55, %59 : vector<16x128xf32>
    %c2_45 = arith.constant 2 : index
    %c0_46 = arith.constant 0 : index
    %61 = vector.load %arg6[%c2_45, %c0_46] : memref<18x128xbf16, #tpu.memory_space<vmem>>, vector<16x128xbf16>
    %c2_47 = arith.constant 2 : index
    %c0_48 = arith.constant 0 : index
    %c0_49 = arith.constant 0 : index
    %62 = vector.load %arg2[%c2_47, %c0_48, %c0_49] : memref<3x128x128xbf16, #tpu.memory_space<vmem>>, vector<1x128x128xbf16>
    %63 = vector.shape_cast %62 : vector<1x128x128xbf16> to vector<128x128xbf16>
    %cst_50 = arith.constant dense<0.000000e+00> : vector<16x128xf32>
    %64 = tpu.matmul %61, %63, %cst_50 {dimension_numbers = #tpu.dot_dimension_numbers<[1], [0], [0], [1], [0, 0, 1, 1], [], []>} : vector<16x128xbf16>, vector<128x128xbf16>, vector<16x128xf32> -> vector<16x128xf32>
    %65 = arith.addf %60, %64 : vector<16x128xf32>
    %c2_51 = arith.constant 2 : index
    %c0_52 = arith.constant 0 : index
    %66 = vector.load %arg4[%c2_51, %c0_52] : memref<4x128xf32, #tpu.memory_space<vmem>>, vector<1x128xf32>
    %c3 = arith.constant 3 : index
    %c0_53 = arith.constant 0 : index
    %67 = vector.load %arg4[%c3, %c0_53] : memref<4x128xf32, #tpu.memory_space<vmem>>, vector<1x128xf32>
    %cst_54 = arith.constant dense<0.000000e+00> : vector<128xf32>
    %68 = vector.multi_reduction <add>, %65, %cst_54 [0] : vector<16x128xf32> to vector<128xf32>
    %69 = vector.shape_cast %68 : vector<128xf32> to vector<1x128xf32>
    %70 = arith.mulf %65, %65 : vector<16x128xf32>
    %cst_55 = arith.constant dense<0.000000e+00> : vector<128xf32>
    %71 = vector.multi_reduction <add>, %70, %cst_55 [0] : vector<16x128xf32> to vector<128xf32>
    %72 = vector.shape_cast %71 : vector<128xf32> to vector<1x128xf32>
    %73 = tpu.concatenate %69, %72 in 0 : vector<1x128xf32>, vector<1x128xf32> -> vector<2x128xf32>
    %cst_56 = arith.constant 0.001953125 : f32
    %74 = vector.broadcast %cst_56 : f32 to vector<2x128xf32>
    %75 = arith.mulf %73, %74 : vector<2x128xf32>
    %c0_57 = arith.constant 0 : index
    %c0_58 = arith.constant 0 : index
    %76 = vector.load %arg3[%c0_57, %c0_58] : memref<128x128xf32, #tpu.memory_space<vmem>>, vector<128x128xf32>
    %cst_59 = arith.constant dense<0.000000e+00> : vector<2x128xf32>
    %77 = tpu.matmul %75, %76, %cst_59 {dimension_numbers = #tpu.dot_dimension_numbers<[1], [0], [0], [1], [0, 0, 1, 1], [], []>} : vector<2x128xf32>, vector<128x128xf32>, vector<2x128xf32> -> vector<2x128xf32>
    %78 = vector.extract_strided_slice %77 {offsets = [0, 0], sizes = [1, 128], strides = [1, 1]} : vector<2x128xf32> to vector<1x128xf32>
    %79 = vector.extract_strided_slice %77 {offsets = [1, 0], sizes = [1, 128], strides = [1, 1]} : vector<2x128xf32> to vector<1x128xf32>
    %80 = arith.mulf %78, %78 : vector<1x128xf32>
    %81 = arith.subf %79, %80 : vector<1x128xf32>
    %cst_60 = arith.constant 0.000000e+00 : f32
    %82 = vector.broadcast %cst_60 : f32 to vector<1x128xf32>
    %83 = arith.maximumf %81, %82 : vector<1x128xf32>
    %cst_61 = arith.constant 9.99999974E-6 : f32
    %84 = vector.broadcast %cst_61 : f32 to vector<1x128xf32>
    %85 = arith.addf %83, %84 : vector<1x128xf32>
    %86 = math.rsqrt %85 : vector<1x128xf32>
    %87 = arith.mulf %66, %86 : vector<1x128xf32>
    %88 = arith.mulf %78, %87 : vector<1x128xf32>
    %89 = arith.subf %67, %88 : vector<1x128xf32>
    %c1_62 = arith.constant 1 : index
    %c0_63 = arith.constant 0 : index
    %90 = vector.load %arg0[%c1_62, %c0_63] : memref<18x128xf32, #tpu.memory_space<vmem>>, vector<16x128xf32>
    %91 = vector.broadcast %87 : vector<1x128xf32> to vector<16x128xf32>
    %92 = arith.mulf %65, %91 : vector<16x128xf32>
    %93 = vector.broadcast %89 : vector<1x128xf32> to vector<16x128xf32>
    %94 = arith.addf %92, %93 : vector<16x128xf32>
    %95 = arith.addf %94, %90 : vector<16x128xf32>
    %cst_64 = arith.constant 0.000000e+00 : f32
    %96 = vector.broadcast %cst_64 : f32 to vector<16x128xf32>
    %97 = arith.maximumf %95, %96 : vector<16x128xf32>
    %c0_65 = arith.constant 0 : index
    %c0_66 = arith.constant 0 : index
    %98 = vector.load %arg5[%c0_65, %c0_66] : memref<16x128xf32, #tpu.memory_space<vmem>>, vector<16x128xf32>
    tpu.vector_store %arg5[%c0_65, %c0_66], %97 {strides = array<i32>} : memref<16x128xf32, #tpu.memory_space<vmem>>, vector<16x128xf32>,
    return
  }
}

</mosaic_0001>

<bundles_post_ra>
// kernel: residual_block_forward.1
= control target key start
LH: loop header
LB: loop body
LE: loop exit
PB: predicated region body
PF: predicated region fallthrough
CT: control target
= control target key end

     0   :  { %v1549_v0 = vmov 0.0   ;;  %vm1550_vm0 = vmmov 0   ;;  %v1551_v2 = vmov 0.0|0.0   ;;  %vm367_vm1 = vcmask 1040384   ;;  %v487_v59 = vld [vmem:[#allocation2] sm:$0x1]  ;;  %s1944_s1 = inlined_call_operand.vmem [shape: bf16[3,128,128], index: 1, kind: input, shape index: {}]   ;;  %s1945_s0 = inlined_call_operand.vmem [shape: f32[18,128], index: 0, kind: input, shape index: {}]   ;;  %s1946_s3 = inlined_call_operand.vmem [shape: f32[128,128], index: 3, kind: input, shape index: {}]   ;;  %s1947_s2 = inlined_call_operand.vmem [shape: bf16[3,128,128], index: 2, kind: input, shape index: {}]   ;;  %s1948_s4 = inlined_call_operand.vmem [shape: f32[4,128], index: 4, kind: input, shape index: {}]   ;;  %s1949_s5 = inlined_call_operand.vmem [shape: f32[16,128], index: 5, kind: output, shape index: {}]  }
   0x1   :  { %1237 = vmatprep.subr.bf16.mxu0 %v1549_v0  ;;  %v1494_v1 = vld [vmem:[%s1944_s1 + $0x40] sm:$0xff]   ;;  %1253 = vmatprep.mubr.msk.bf16.mxu0 %vm1550_vm0, %v1549_v0  ;;  %v1495_v3 = vld [vmem:[%s1944_s1 + $0x48] sm:$0xff]   ;;  %v1496_v4 = vld [vmem:[%s1944_s1 + $0x50] sm:$0xff]   ;;  %vm485_vm2 = vsmask.f32 256  ;;  %vm523_vm7 = vcmask 1043456  }
   0x2   :  { %1427 = vmatprep.subr.bf16.mxu1 %v1551_v2  ;;  %1329 = vmatprep.mubr.msk.f32.mxu1 %vm1550_vm0, %v1549_v0  ;;  %v1497_v5 = vld [vmem:[%s1944_s1 + $0x58] sm:$0xff]   ;;  %v1498_v6 = vld [vmem:[%s1944_s1 + $0x60] sm:$0xff]   ;;  %v1499_v7 = vld [vmem:[%s1944_s1 + $0x68] sm:$0xff]   ;;  %vm490_vm3 = vsmask.f32 7938  ;;  %vm790_vm10 = vcmask 1046528  }
   0x3   :  { %1238 = vmatpush3.bf16.msra.mxu0 %v1494_v1  ;;  %v1500_v8 = vld [vmem:[%s1944_s1 + $0x70] sm:$0xff]   ;;  %v1501_v9 = vld [vmem:[%s1944_s1 + $0x78] sm:$0xff]   ;;  %v1621_v10 = vld [vmem:[%s1945_s0 + $0x1] sm:$0xff]  ;;  %vm501_vm6 = vsmask.f32 4368 }
   0x4   :  { %1239 = vmatprep.subr.bf16.mxu0 %v1549_v0  ;;  %v1626_v11 = vld [vmem:[%s1945_s0 + $0x9] sm:$0xff]  ;;  %v370_v12 = vld [vmem:[%s1946_s3] sm:$0xff]  ;;  %v373_v16 = vld [vmem:[%s1946_s3 + $0x18] sm:$0xff]  ;;  %vm576_vm11 = vsmask.f32 7424 }
   0x5   :  { %v371_v13 = vld [vmem:[%s1946_s3 + $0x8] sm:$0xff]  ;;  %v372_v14 = vld [vmem:[%s1946_s3 + $0x10] sm:$0xff]  ;;  %v42_v17 = vpack.c.bf16 %v1626_v11, %v1621_v10  ;;  %v1502_v19 = vld [vmem:[%s1944_s1] sm:$0xff]  }
   0x6   :  { %v1638_v15 = vpack.c.bf16 %v371_v13, %v370_v12  ;;  %v1646_v18 = vpack.c.bf16 %v373_v16, %v372_v14  ;;  %v374_v20 = vld [vmem:[%s1946_s3 + $0x20] sm:$0xff]  ;;  %v375_v21 = vld [vmem:[%s1946_s3 + $0x28] sm:$0xff]  ;;  %v1504_v24 = vld [vmem:[%s1944_s1 + $0x10] sm:$0xff]  }
   0x7   :  { %1240 = vmatpush3.bf16.msra.mxu0 %v1495_v3  ;;  %v1660_v22 = vpack.c.bf16 %v375_v21, %v374_v20  ;;  %v1503_v23 = vld [vmem:[%s1944_s1 + $0x8] sm:$0xff]   ;;  %v1505_v25 = vld [vmem:[%s1944_s1 + $0x18] sm:$0xff]   ;;  %v1506_v26 = vld [vmem:[%s1944_s1 + $0x20] sm:$0xff]  }
   0x8   :  { %1241 = vmatprep.subr.bf16.mxu0 %v1549_v0  ;;  %1429 = vmatpush3.bf16.msra.mxu1 %v1638_v15  ;;  %v1507_v27 = vld [vmem:[%s1944_s1 + $0x28] sm:$0xff]   ;;  %v1508_v28 = vld [vmem:[%s1944_s1 + $0x30] sm:$0xff]   ;;  %v1509_v29 = vld [vmem:[%s1944_s1 + $0x38] sm:$0xff]  }
   0x9   :  { %1430 = vmatprep.subr.bf16.mxu1 %v1551_v2  ;;  %v21_v30 = vld [vmem:[%s1945_s0] sm:$0xff]  ;;  %v22_v31 = vld [vmem:[%s1945_s0 + $0x8] sm:$0xff]  ;;  %v1512_v35 = vld [vmem:[%s1944_s1 + $0x90] sm:$0xff]  }
   0xa   :  { %v23_v32 = vpack.c.bf16 %v22_v31, %v21_v30  ;;  %v1510_v33 = vld [vmem:[%s1944_s1 + $0x80] sm:$0xff]   ;;  %v1511_v34 = vld [vmem:[%s1944_s1 + $0x88] sm:$0xff]   ;;  %v1513_v36 = vld [vmem:[%s1944_s1 + $0x98] sm:$0xff]  }
   0xb   :  { %1242 = vmatpush3.bf16.msra.mxu0 %v1496_v4  ;;  %v1514_v37 = vld [vmem:[%s1944_s1 + $0xa0] sm:$0xff]   ;;  %v1515_v38 = vld [vmem:[%s1944_s1 + $0xa8] sm:$0xff]   ;;  %v1516_v39 = vld [vmem:[%s1944_s1 + $0xb0] sm:$0xff]  }
   0xc   :  { %1243 = vmatprep.subr.bf16.mxu0 %v1549_v0  ;;  %1432 = vmatpush3.bf16.msra.mxu1 %v1646_v18  ;;  %v1517_v40 = vld [vmem:[%s1944_s1 + $0xb8] sm:$0xff]   ;;  %v238_v41 = vld [vmem:[%s1945_s0 + $0x2] sm:$0xff]  ;;  %v239_v42 = vld [vmem:[%s1945_s0 + $0xa] sm:$0xff] }
   0xd   :  { %1433 = vmatprep.subr.bf16.mxu1 %v1551_v2  ;;  %v240_v43 = vpack.c.bf16 %v239_v42, %v238_v41  ;;  %v376_v44 = vld [vmem:[%s1946_s3 + $0x30] sm:$0xff]  ;;  %v377_v45 = vld [vmem:[%s1946_s3 + $0x38] sm:$0xff]  ;;  %v378_v47 = vld [vmem:[%s1946_s3 + $0x40] sm:$0xff] }
   0xe   :  { %v1437_v46 = vpack.c.bf16 %v377_v45, %v376_v44  ;;  %v379_v48 = vld [vmem:[%s1946_s3 + $0x48] sm:$0xff]  ;;  %v380_v50 = vld [vmem:[%s1946_s3 + $0x50] sm:$0xff]  ;;  %v381_v51 = vld [vmem:[%s1946_s3 + $0x58] sm:$0xff] }
   0xf   :  { %1244 = vmatpush3.bf16.msra.mxu0 %v1497_v5  ;;  %v1440_v49 = vpack.c.bf16 %v379_v48, %v378_v47  ;;  %v1443_v52 = vpack.c.bf16 %v381_v51, %v380_v50  ;;  %v382_v53 = vld [vmem:[%s1946_s3 + $0x60] sm:$0xff]  ;;  %v383_v54 = vld [vmem:[%s1946_s3 + $0x68] sm:$0xff]  ;;  %v384_v56 = vld [vmem:[%s1946_s3 + $0x70] sm:$0xff] }
  0x10   :  { %1245 = vmatprep.subr.bf16.mxu0 %v1549_v0  ;;  %1435 = vmatpush3.bf16.msra.mxu1 %v1660_v22  ;;  %v1446_v55 = vpack.c.bf16 %v383_v54, %v382_v53  ;;  %v385_v57 = vld [vmem:[%s1946_s3 + $0x78] sm:$0xff]  ;;  %vm1791_vm4 = vmand %vm367_vm1, %vm485_vm2  ;;  %v492_v61 = vld [vmem:[#allocation2 + $0x8] sm:$0x1] }
  0x11   :  { %1436 = vmatprep.subr.bf16.mxu1 %v1551_v2  ;;  %v1449_v58 = vpack.c.bf16 %v385_v57, %v384_v56  ;;  %v488_v62 = vsel %vm1791_vm4, 0, %v487_v59  ;;  %vm491_vm5 = vmand %vm367_vm1, %vm490_vm3  ;;  %v1523_v30 = vld [vmem:[%s1947_s2 + $0x68] sm:$0xff]   ;;  %v1524_v31 = vld [vmem:[%s1947_s2 + $0x70] sm:$0xff]  }
  0x12   :  { %489 = vst [vmem:[#allocation2] sm:$0x1] %v488_v62  ;;  %v493_v63 = vsel %vm491_vm5, 0, %v492_v61  ;;  %v350_v47 = vld [vmem:[%s1948_s4 + $0x1] sm:$0x1]  ;;  %vm502_vm8 = vmor %vm485_vm2, %vm501_vm6 }
  0x13   :  { %1246 = vmatpush3.bf16.msra.mxu0 %v1498_v6  ;;  %494 = vst [vmem:[#allocation2 + $0x8] sm:$0x1] %v493_v63  ;;  %vm524_vm9 = vmand %vm523_vm7, %vm490_vm3 }
  0x14   :  { %1247 = vmatprep.subr.bf16.mxu0 %v1549_v0  ;;  %1438 = vmatpush3.bf16.msra.mxu1 %v1437_v46 }
  0x15   :  { %1439 = vmatprep.subr.bf16.mxu1 %v1551_v2 }
  0x17   :  { %1248 = vmatpush3.bf16.msra.mxu0 %v1499_v7 }
  0x18   :  { %1249 = vmatprep.subr.bf16.mxu0 %v1549_v0  ;;  %1441 = vmatpush3.bf16.msra.mxu1 %v1440_v49 }
  0x19   :  { %1442 = vmatprep.subr.bf16.mxu1 %v1551_v2 }
  0x1b   :  { %1250 = vmatpush3.bf16.msra.mxu0 %v1500_v8 }
  0x1c   :  { %1251 = vmatprep.subr.bf16.mxu0 %v1549_v0  ;;  %1444 = vmatpush3.bf16.msra.mxu1 %v1443_v52 }
  0x1d   :  { %1445 = vmatprep.subr.bf16.mxu1 %v1551_v2 }
  0x1f   :  { %1252 = vmatpush3.bf16.msra.mxu0 %v1501_v9 }
  0x20   :  { %1257 = vmatprep.subr.bf16.mxu0 %v1549_v0  ;;  %1447 = vmatpush3.bf16.msra.mxu1 %v1446_v55 }
  0x21   :  { %1448 = vmatprep.subr.bf16.mxu1 %v1551_v2 }
  0x22   :  { %1254 = vmatmul.mubr.bf16.vlgmr.msra.gmra.mrb[0].mxu0 %v42_v17 }
  0x23   :  { %1258 = vmatpush3.bf16.msra.mxu0 %v1502_v19  ;;  %1273 = vmatprep.mubr.msk.bf16.mxu0 %vm1550_vm0, %v1549_v0 }
  0x24   :  { %1259 = vmatprep.subr.bf16.mxu0 %v1549_v0  ;;  %1450 = vmatpush3.bf16.msra.mxu1 %v1449_v58 }
  0x25   :  { %1332 = vmatprep.subr.bf16.mxu1 %v1549_v0 }
  0x27   :  { %1260 = vmatpush3.bf16.msra.mxu0 %v1503_v23 }
  0x28   :  { %1261 = vmatprep.subr.bf16.mxu0 %v1549_v0 }
  0x2b   :  { %1262 = vmatpush3.bf16.msra.mxu0 %v1504_v24 }
  0x2c   :  { %1263 = vmatprep.subr.bf16.mxu0 %v1549_v0 }
  0x2f   :  { %1264 = vmatpush3.bf16.msra.mxu0 %v1505_v25  ;;  %v1518_v25 = vld [vmem:[%s1947_s2 + $0x40] sm:$0xff]  }
  0x30   :  { %1265 = vmatprep.subr.bf16.mxu0 %v1549_v0 }
  0x33   :  { %1266 = vmatpush3.bf16.msra.mxu0 %v1506_v26  ;;  %v1519_v26 = vld [vmem:[%s1947_s2 + $0x48] sm:$0xff]  }
  0x34   :  { %1267 = vmatprep.subr.bf16.mxu0 %v1549_v0 }
  0x37   :  { %1268 = vmatpush3.bf16.msra.mxu0 %v1507_v27  ;;  %v1520_v27 = vld [vmem:[%s1947_s2 + $0x50] sm:$0xff]  }
  0x38   :  { %1269 = vmatprep.subr.bf16.mxu0 %v1549_v0 }
  0x3b   :  { %1270 = vmatpush3.bf16.msra.mxu0 %v1508_v28  ;;  %v1521_v28 = vld [vmem:[%s1947_s2 + $0x58] sm:$0xff]  }
  0x3c   :  { %1271 = vmatprep.subr.bf16.mxu0 %v1549_v0 }
  0x3f   :  { %1272 = vmatpush3.bf16.msra.mxu0 %v1509_v29  ;;  %v1522_v29 = vld [vmem:[%s1947_s2 + $0x60] sm:$0xff]  }
  0x40   :  { %1277 = vmatprep.subr.bf16.mxu0 %v1549_v0 }
  0x42   :  { %1274 = vmatmul.mubr.bf16.vlgmr.msra.gmra.mrb[0].mxu0 %v23_v32  ;;  %v1525_v32 = vld [vmem:[%s1947_s2 + $0x78] sm:$0xff]  }
  0x43   :  { %1278 = vmatpush3.bf16.msra.mxu0 %v1510_v33  ;;  %1293 = vmatprep.mubr.msk.bf16.mxu0 %vm1550_vm0, %v1549_v0 }
  0x44   :  { %1279 = vmatprep.subr.bf16.mxu0 %v1549_v0 }
  0x47   :  { %1280 = vmatpush3.bf16.msra.mxu0 %v1511_v34 }
  0x48   :  { %1281 = vmatprep.subr.bf16.mxu0 %v1549_v0 }
  0x4b   :  { %1282 = vmatpush3.bf16.msra.mxu0 %v1512_v35 }
  0x4c   :  { %1283 = vmatprep.subr.bf16.mxu0 %v1549_v0 }
  0x4f   :  { %1284 = vmatpush3.bf16.msra.mxu0 %v1513_v36 }
  0x50   :  { %1285 = vmatprep.subr.bf16.mxu0 %v1549_v0 }
  0x53   :  { %1286 = vmatpush3.bf16.msra.mxu0 %v1514_v37 }
  0x54   :  { %1287 = vmatprep.subr.bf16.mxu0 %v1549_v0 }
  0x57   :  { %1288 = vmatpush3.bf16.msra.mxu0 %v1515_v38 }
  0x58   :  { %1289 = vmatprep.subr.bf16.mxu0 %v1549_v0 }
  0x5b   :  { %1290 = vmatpush3.bf16.msra.mxu0 %v1516_v39 }
  0x5c   :  { %1291 = vmatprep.subr.bf16.mxu0 %v1549_v0 }
  0x5f   :  { %1292 = vmatpush3.bf16.msra.mxu0 %v1517_v40  ;;  %v470_v40 = vlaneseq }
  0x60   :  { %1451 = vmatprep.subr.bf16.mxu0 %v1551_v2 }
  0x61   :  { %v471_v41 = vshrl.u32 %v470_v40, 7  ;;  %v1538_v40 = vld [vmem:[%s1947_s2 + $0x90] sm:$0xff]  }
  0x62   :  { %1294 = vmatmul.mubr.bf16.vlgmr.msra.gmra.mrb[0].mxu0 %v240_v43  ;;  %v349_v43 = vld [vmem:[%s1948_s4] sm:$0x1] }
  0x63   :  { %1453 = vmatpush3.bf16.msra.mxu0 %v1638_v15  ;;  %1424 = vmatprep.mubr.msk.f32.mxu0 %vm1550_vm0, %v1549_v0  ;;  %v1847_v45 = vsub.s32 0, %v471_v41  ;;  %v1539_v41 = vld [vmem:[%s1947_s2 + $0x98] sm:$0xff]  }
  0x64   :  { %1454 = vmatprep.subr.bf16.mxu0 %v1551_v2 }
  0x67   :  { %1456 = vmatpush3.bf16.msra.mxu0 %v1646_v18 }
  0x68   :  { %1457 = vmatprep.subr.bf16.mxu0 %v1551_v2 }
  0x6b   :  { %1459 = vmatpush3.bf16.msra.mxu0 %v1660_v22 }
  0x6c   :  { %1460 = vmatprep.subr.bf16.mxu0 %v1551_v2 }
  0x6f   :  { %1462 = vmatpush3.bf16.msra.mxu0 %v1437_v46 }
  0x70   :  { %1463 = vmatprep.subr.bf16.mxu0 %v1551_v2 }
  0x73   :  { %1465 = vmatpush3.bf16.msra.mxu0 %v1440_v49 }
  0x74   :  { %1466 = vmatprep.subr.bf16.mxu0 %v1551_v2 }
  0x77   :  { %1468 = vmatpush3.bf16.msra.mxu0 %v1443_v52 }
  0x78   :  { %1469 = vmatprep.subr.bf16.mxu0 %v1551_v2 }
  0x7b   :  { %1471 = vmatpush3.bf16.msra.mxu0 %v1446_v55 }
  0x7c   :  { %1472 = vmatprep.subr.bf16.mxu0 %v1551_v2 }
  0x7f   :  { %1474 = vmatpush3.bf16.msra.mxu0 %v1449_v58 }
 0x135   :  { %v1799_v1 = vpop.f32.mrb[0].mxu0 }
 0x136   :  { %v1295_v2 = vpop.f32.mrb[1].mxu0  ;;  %v358_v4 = vmul.f32 %v1799_v1, %v1799_v1 }
 0x137   :  { %v1801_v3 = vpop.f32.mrb[2].mxu0 }
 0x138   :  { %v351_v5 = vadd.f32 %v1801_v3, %v1799_v1  ;;  %v359_v6 = vmul.f32 %v1801_v3, %v1801_v3  ;;  %v1296_v7 = vpop.f32.mrb[3].mxu0 }
 0x13a   :  { %v352_v8 = vrot.slane %v351_v5, 4  ;;  %v360_v9 = vadd.f32 %v359_v6, %v358_v4 }
 0x13c   :  { %v353_v12 = vadd.f32 %v352_v8, %v351_v5  ;;  %v361_v13 = vrot.slane %v360_v9, 4  ;;  %v529_v5 = vld [vmem:[#allocation2 + $0x8] sm:$0x1] }
 0x13e   :  { %v354_v14 = vrot.slane %v353_v12, 2  ;;  %v362_v15 = vadd.f32 %v361_v13, %v360_v9 }
 0x140   :  { %v355_v16 = vadd.f32 %v354_v14, %v353_v12  ;;  %v363_v17 = vrot.slane %v362_v15, 2 }
 0x142   :  { %v356_v18 = vrot.slane %v355_v16, 1  ;;  %v364_v19 = vadd.f32 %v363_v17, %v362_v15 }
 0x144   :  { %v365_v20 = vrot.slane %v364_v19, 1  ;;  %v357_v21 = vadd.f32 %v356_v18, %v355_v16 }
 0x146   :  { %v366_v22 = vadd.f32 %v365_v20, %v364_v19 }
 0x148   :  { %v368_v23 = vsel %vm367_vm1, %v357_v21, %v366_v22 }
 0x149   :  { %v369_v24 = vmul.f32 0.001953125, %v368_v23 }
 0x14b   :  { %1330 = vmatmul.mubr.f32.vlgmr.msra.gmra.mrb[0].mxu1 %v369_v24 }
 0x14c   :  { %1348 = vmatprep.mubr.msk.bf16.mxu1 %vm1550_vm0, %v1549_v0  ;;  %1333 = vmatpush3.bf16.msra.mxu1 %v1518_v25 }
 0x14d   :  { %1334 = vmatprep.subr.bf16.mxu1 %v1549_v0 }
 0x150   :  { %1335 = vmatpush3.bf16.msra.mxu1 %v1519_v26 }
 0x151   :  { %1336 = vmatprep.subr.bf16.mxu1 %v1549_v0 }
 0x154   :  { %1337 = vmatpush3.bf16.msra.mxu1 %v1520_v27 }
 0x155   :  { %1338 = vmatprep.subr.bf16.mxu1 %v1549_v0 }
 0x158   :  { %1339 = vmatpush3.bf16.msra.mxu1 %v1521_v28 }
 0x159   :  { %1340 = vmatprep.subr.bf16.mxu1 %v1549_v0 }
 0x15c   :  { %1341 = vmatpush3.bf16.msra.mxu1 %v1522_v29  ;;  %v1528_v29 = vld [vmem:[%s1947_s2] sm:$0xff]  }
 0x15d   :  { %1342 = vmatprep.subr.bf16.mxu1 %v1549_v0 }
 0x160   :  { %1343 = vmatpush3.bf16.msra.mxu1 %v1523_v30 }
 0x161   :  { %1344 = vmatprep.subr.bf16.mxu1 %v1549_v0 }
 0x164   :  { %1345 = vmatpush3.bf16.msra.mxu1 %v1524_v31  ;;  %v1529_v31 = vld [vmem:[%s1947_s2 + $0x8] sm:$0xff]  }
 0x165   :  { %1346 = vmatprep.subr.bf16.mxu1 %v1549_v0 }
 0x168   :  { %1347 = vmatpush3.bf16.msra.mxu1 %v1525_v32  ;;  %v1530_v32 = vld [vmem:[%s1947_s2 + $0x10] sm:$0xff]  }
 0x169   :  { %1352 = vmatprep.subr.bf16.mxu1 %v1549_v0 }
 0x21e   :  { %v452_v33 = vpop.f32.mrb[0].mxu1 }
 0x21f   :  { %v456_v34 = vmul.f32 %v452_v33, %v452_v33  ;;  %v1331_v35 = vpop.f32.mrb[1].mxu1 }
 0x220   :  { %v1533_v35 = vld [vmem:[%s1947_s2 + $0x28] sm:$0xff]  }
 0x221   :  { %v458_v36 = vrot.slane %v456_v34, 7  ;;  %v1532_v34 = vld [vmem:[%s1947_s2 + $0x20] sm:$0xff]  }
 0x223   :  { %v460_v37 = vsub.f32 %v452_v33, %v458_v36  ;;  %v1534_v36 = vld [vmem:[%s1947_s2 + $0x30] sm:$0xff]  }
 0x225   :  { %v461_v38 = vmax.f32 %v460_v37, 0.0  ;;  %v1535_v37 = vld [vmem:[%s1947_s2 + $0x38] sm:$0xff]  }
 0x227   :  { %v462_v39 = vadd.f32 1e-05, %v461_v38  ;;  %v1536_v38 = vld [vmem:[%s1947_s2 + $0x80] sm:$0xff]  }
 0x229   :  { %1545 = vrsqrt.f32 %v462_v39  ;;  %v1537_v39 = vld [vmem:[%s1947_s2 + $0x88] sm:$0xff]  }
 0x233   :  { %v1546_v42 = vpop.eup %1545 }
 0x234   :  { %v465_v44 = vrot.slane %v1546_v42, 1  ;;  %v1540_v42 = vld [vmem:[%s1947_s2 + $0xa0] sm:$0xff]  }
 0x236   :  { %v467_v46 = vmul.f32 %v465_v44, %v349_v43  ;;  %v1541_v43 = vld [vmem:[%s1947_s2 + $0xa8] sm:$0xff]   ;;  %v1542_v44 = vld [vmem:[%s1947_s2 + $0xb0] sm:$0xff]  }
 0x238   :  { %v468_v48 = vmul.f32 %v467_v46, %v452_v33  ;;  %v473_v49 = vrot.slane %v467_v46, %v1847_v45  ;;  %v1531_v33 = vld [vmem:[%s1947_s2 + $0x18] sm:$0xff]  }
 0x239   :  { %v1543_v46 = vld [vmem:[%s1947_s2 + $0xb8] sm:$0xff]  }
 0x23a   :  { %v469_v50 = vsub.f32 %v350_v47, %v468_v48  ;;  %v474_v51 = vmul.f32 %v473_v49, %v1799_v1  ;;  %v475_v52 = vmul.f32 %v473_v49, %v1801_v3  ;;  %v525_v3 = vld [vmem:[#allocation2] sm:$0xf] }
 0x23c   :  { %v479_v53 = vrot.slane %v469_v50, %v1847_v45 }
 0x23e   :  { %v480_v54 = vadd.f32 %v479_v53, %v474_v51  ;;  %v481_v55 = vadd.f32 %v479_v53, %v475_v52 }
 0x240   :  { %v482_v56 = vmax.f32 %v480_v54, 0.0  ;;  %v483_v57 = vmax.f32 %v481_v55, 0.0 }
 0x242   :  { %v1147_v58 = vpack.c.bf16 %v482_v56, %v482_v56  ;;  %v1148_v59 = vpack.c.bf16 %v483_v57, %v483_v57 }
 0x244   :  { %v504_v61 = vshrl.u32 %v1147_v58, 16  ;;  %v512_v62 = vshrl.u32 %v1148_v59, 16  ;;  %v507_v2 = vshll.u32 %v1147_v58, 16  ;;  %v515_v1 = vshll.u32 %v1148_v59, 16 }
 0x246   :  { %v506_v63 = vrot.slane %v504_v61, 7  ;;  %v514_v4 = vrot.slane %v512_v62, 7 }
 0x248   :  { %v509_v6 = vor.u32 %v507_v2, %v506_v63  ;;  %v510_v7 = vrot.slane %v506_v63, 4  ;;  %v517_v8 = vor.u32 %v515_v1, %v514_v4  ;;  %v519_v9 = vrot.slane %v514_v4, 4 }
 0x24a   :  { %v518_v12 = vsel %vm502_vm8, %v510_v7, %v517_v8  ;;  %v526_v13 = vsel %vm524_vm9, %v509_v6, %v525_v3  ;;  %v530_v14 = vsel %vm1791_vm4, %v519_v9, %v529_v5 }
 0x24b   :  { %527 = vst [vmem:[#allocation2] sm:$0xf] %v526_v13  ;;  %528 = vst [vmem:[#allocation2 + $0x4] sm:$0xf] %v518_v12 }
 0x24c   :  { %531 = vst [vmem:[#allocation2 + $0x8] sm:$0x1] %v530_v14 }
 0x252   :  { %v532_v15 = vld [vmem:[#allocation2] sm:$0xf]  ;;  %v533_v16 = vld [vmem:[#allocation2 + $0x4] sm:$0xf] }
 0x253   :  { %v1104_v17 = vcombine.low %v532_v15, %v533_v16  ;;  %v1527_v18 = vld [vmem:[#allocation2 + $0x8] ss:$0 sps:$4 sm:$0x11]   ;;  %v769_v19 = vld [vmem:[#allocation2] sm:$0xe] }
 0x254   :  { %v1138_v20 = vcombine.low %v769_v19, %v533_v16  ;;  %v585_v22 = vshll.u32 %v1527_v18, 16  ;;  %v792_v23 = vrot.slane %v1527_v18, 1  ;;  %v886_v16 = vld [vmem:[%s1948_s4 + $0x2] sm:$0x1]  ;;  %v887_v19 = vld [vmem:[%s1948_s4 + $0x3] sm:$0x1] }
 0x255   :  { %v580_v21 = vshll.u32 %v1104_v17, 16  ;;  %v578_v25 = vshrl.u32 %v1104_v17, 16 }
 0x256   :  { %v791_v24 = vrot.slane %v1138_v20, 1  ;;  %v587_v28 = vrot.slane %v585_v22, 1 }
 0x257   :  { %v582_v26 = vrot.slane %v580_v21, 1 }
 0x258   :  { %v793_v27 = vsel %vm790_vm10, %v791_v24, %v792_v23 }
 0x259   :  { %v583_v60 = vor.u32 %v582_v26, %v578_v25 }
 0x25b   :  { %v588_v30 = vsel %vm576_vm11, %v583_v60, %v587_v28 }
 0x25c   :  { %1349 = vmatmul.mubr.bf16.vlgmr.msra.gmra.mrb[4].mxu1 %v588_v30 }
 0x25d   :  { %1353 = vmatpush3.bf16.msra.mxu1 %v1528_v29  ;;  %1368 = vmatprep.mubr.msk.bf16.mxu1 %vm1550_vm0, %v1549_v0 }
 0x25e   :  { %1354 = vmatprep.subr.bf16.mxu1 %v1549_v0 }
 0x261   :  { %1355 = vmatpush3.bf16.msra.mxu1 %v1529_v31 }
 0x262   :  { %1356 = vmatprep.subr.bf16.mxu1 %v1549_v0 }
 0x265   :  { %1357 = vmatpush3.bf16.msra.mxu1 %v1530_v32 }
 0x266   :  { %1358 = vmatprep.subr.bf16.mxu1 %v1549_v0 }
 0x269   :  { %1359 = vmatpush3.bf16.msra.mxu1 %v1531_v33 }
 0x26a   :  { %1360 = vmatprep.subr.bf16.mxu1 %v1549_v0 }
 0x26d   :  { %1361 = vmatpush3.bf16.msra.mxu1 %v1532_v34 }
 0x26e   :  { %1362 = vmatprep.subr.bf16.mxu1 %v1549_v0 }
 0x271   :  { %1363 = vmatpush3.bf16.msra.mxu1 %v1533_v35 }
 0x272   :  { %1364 = vmatprep.subr.bf16.mxu1 %v1549_v0 }
 0x275   :  { %1365 = vmatpush3.bf16.msra.mxu1 %v1534_v36 }
 0x276   :  { %1366 = vmatprep.subr.bf16.mxu1 %v1549_v0 }
 0x279   :  { %1367 = vmatpush3.bf16.msra.mxu1 %v1535_v37 }
 0x27a   :  { %1372 = vmatprep.subr.bf16.mxu1 %v1549_v0 }
 0x27c   :  { %1369 = vmatmul.mubr.bf16.vlgmr.msra.gmra.mrb[4].mxu1 %v1104_v17 }
 0x27d   :  { %1373 = vmatpush3.bf16.msra.mxu1 %v1536_v38  ;;  %1388 = vmatprep.mubr.msk.bf16.mxu1 %vm1550_vm0, %v1549_v0 }
 0x27e   :  { %1374 = vmatprep.subr.bf16.mxu1 %v1549_v0 }
 0x281   :  { %1375 = vmatpush3.bf16.msra.mxu1 %v1537_v39 }
 0x282   :  { %1376 = vmatprep.subr.bf16.mxu1 %v1549_v0 }
 0x285   :  { %1377 = vmatpush3.bf16.msra.mxu1 %v1538_v40 }
 0x286   :  { %1378 = vmatprep.subr.bf16.mxu1 %v1549_v0 }
 0x289   :  { %1379 = vmatpush3.bf16.msra.mxu1 %v1539_v41 }
 0x28a   :  { %1380 = vmatprep.subr.bf16.mxu1 %v1549_v0 }
 0x28d   :  { %1381 = vmatpush3.bf16.msra.mxu1 %v1540_v42 }
 0x28e   :  { %1382 = vmatprep.subr.bf16.mxu1 %v1549_v0 }
 0x291   :  { %1383 = vmatpush3.bf16.msra.mxu1 %v1541_v43 }
 0x292   :  { %1384 = vmatprep.subr.bf16.mxu1 %v1549_v0 }
 0x295   :  { %1385 = vmatpush3.bf16.msra.mxu1 %v1542_v44 }
 0x296   :  { %1386 = vmatprep.subr.bf16.mxu1 %v1549_v0 }
 0x299   :  { %1387 = vmatpush3.bf16.msra.mxu1 %v1543_v46 }
 0x29c   :  { %1389 = vmatmul.mubr.bf16.vlgmr.msra.gmra.mrb[4].mxu1 %v793_v27 }
 0x36f   :  { %v877_v47 = vpop.f32.mrb[4].mxu1 }
 0x370   :  { %v1390_v48 = vpop.f32.mrb[5].mxu1  ;;  %v895_v50 = vmul.f32 %v877_v47, %v877_v47 }
 0x371   :  { %v880_v49 = vpop.f32.mrb[6].mxu1 }
 0x372   :  { %v888_v51 = vadd.f32 %v880_v49, %v877_v47  ;;  %v896_v52 = vmul.f32 %v880_v49, %v880_v49  ;;  %v1391_v53 = vpop.f32.mrb[7].mxu1 }
 0x374   :  { %v889_v54 = vrot.slane %v888_v51, 4  ;;  %v897_v55 = vadd.f32 %v896_v52, %v895_v50 }
 0x376   :  { %v890_v56 = vadd.f32 %v889_v54, %v888_v51  ;;  %v898_v57 = vrot.slane %v897_v55, 4 }
 0x378   :  { %v891_v58 = vrot.slane %v890_v56, 2  ;;  %v899_v59 = vadd.f32 %v898_v57, %v897_v55 }
 0x37a   :  { %v892_v61 = vadd.f32 %v891_v58, %v890_v56  ;;  %v900_v62 = vrot.slane %v899_v59, 2 }
 0x37c   :  { %v893_v63 = vrot.slane %v892_v61, 1  ;;  %v901_v2 = vadd.f32 %v900_v62, %v899_v59 }
 0x37e   :  { %v902_v0 = vrot.slane %v901_v2, 1  ;;  %v894_v4 = vadd.f32 %v893_v63, %v892_v61 }
 0x380   :  { %v903_v1 = vadd.f32 %v902_v0, %v901_v2 }
 0x382   :  { %v904_v3 = vsel %vm367_vm1, %v894_v4, %v903_v1 }
 0x383   :  { %v905_v5 = vmul.f32 0.001953125, %v904_v3 }
 0x385   :  { %1425 = vmatmul.mubr.f32.vlgmr.msra.gmra.mrb[4].mxu0 %v905_v5 }
 0x458   :  { %v988_v6 = vpop.f32.mrb[4].mxu0 }
 0x459   :  { %v992_v7 = vmul.f32 %v988_v6, %v988_v6  ;;  %v1426_v8 = vpop.f32.mrb[5].mxu0 }
 0x45b   :  { %v994_v9 = vrot.slane %v992_v7, 7 }
 0x45d   :  { %v996_v12 = vsub.f32 %v988_v6, %v994_v9 }
 0x45f   :  { %v997_v13 = vmax.f32 %v996_v12, 0.0 }
 0x461   :  { %v998_v14 = vadd.f32 1e-05, %v997_v13 }
 0x463   :  { %1547 = vrsqrt.f32 %v998_v14 }
 0x46d   :  { %v1548_v15 = vpop.eup %1547 }
 0x46e   :  { %v1001_v17 = vrot.slane %v1548_v15, 1 }
 0x470   :  { %v1003_v18 = vmul.f32 %v1001_v17, %v886_v16 }
 0x472   :  { %v1004_v20 = vmul.f32 %v1003_v18, %v988_v6  ;;  %v1011_v21 = vrot.slane %v1003_v18, %v1847_v45 }
 0x474   :  { %v1005_v22 = vsub.f32 %v887_v19, %v1004_v20  ;;  %v1012_v23 = vmul.f32 %v1011_v21, %v877_v47  ;;  %v1013_v24 = vmul.f32 %v1011_v21, %v880_v49 }
 0x476   :  { %v1017_v25 = vrot.slane %v1005_v22, %v1847_v45 }
 0x478   :  { %v1018_v26 = vadd.f32 %v1017_v25, %v1012_v23  ;;  %v1019_v27 = vadd.f32 %v1017_v25, %v1013_v24 }
 0x47a   :  { %v1020_v60 = vadd.f32 %v1018_v26, %v1621_v10  ;;  %v1021_v28 = vadd.f32 %v1019_v27, %v1626_v11 }
 0x47c   :  { %v1022_v29 = vmax.f32 %v1020_v60, 0.0  ;;  %v1023_v30 = vmax.f32 %v1021_v28, 0.0 }
 0x47e   :  { %1024 = vst [vmem:[%s1949_s5] sm:$0xff] %v1022_v29  ;;  %1025 = vst [vmem:[%s1949_s5 + $0x8] sm:$0xff] %v1023_v30 }

</bundles_post_ra>
